<compile_context>
chip_gen: v7x
topology: tpu7x:2x2x1
jax: 0.10.0
libtpu: 0.0.40
codegen_flags: <defaults>
</compile_context>

<pallas_src>
import functools

import jax
import jax.numpy as jnp
from jax import lax
from jax.experimental import pallas as pl
from jax.experimental.pallas import tpu as pltpu

_LANES = 128
_VMEM_BLOCK_BUDGET = 40 * 1024 * 1024  # double-buffered blocks; safe on v7x (64 MiB VMEM)


def _round_up(n, m):
    return -(-n // m) * m


def _fm_kernel(x_ref, o_ref, *, num_fields, embed_dim, row_chunk, grouped, reduce_sum):
    """Process one (tb, F*D) lane-dense batch block.

    Streams the block in `row_chunk`-row sub-chunks (lax.fori_loop) so the f32
    accumulators stay vreg-resident instead of round-tripping VMEM.
    """
    F, D, rc = num_fields, embed_dim, row_chunk
    n_chunks = x_ref.shape[0] // rc

    def chunk(r, carry):
        r0 = pl.multiple_of(r * rc, rc)

        if grouped:
            # Lane-aligned accumulation over 128-wide column groups, then a
            # log2(G) cyclic-roll segmented reduction (XLU) recovers the
            # per-dimension field sums, replicated G = 128 // D times per vreg.
            C = x_ref.shape[1] // _LANES
            G = _LANES // D
            xg = x_ref[pl.ds(r0, rc), 0:_LANES].astype(jnp.float32)
            s, ss = xg, xg * xg
            for c in range(1, C):  # static; C = F*D/128 column groups
                xg = x_ref[pl.ds(r0, rc), c * _LANES:(c + 1) * _LANES].astype(jnp.float32)
                s = s + xg
                ss = ss + xg * xg

            s_full = s
            shift = D
            while shift < _LANES:
                s_full = s_full + pltpu.roll(s_full, shift=shift, axis=1)
                shift *= 2
            # s_full[:, l] == sum_f x[:, f, l % D]  (replicated G times)

            if reduce_sum:
                # lane_sum(s_full^2)/G == sum_d (sum_f x)^2 ;  lane_sum(ss) == sum_d sum_f x^2
                ix = s_full * s_full * (1.0 / G) - ss
                out = 0.5 * jnp.sum(ix, axis=1, keepdims=True)
                o_ref[pl.ds(r0, rc), :] = out.astype(o_ref.dtype)
            else:
                ss_full = ss
                shift = D
                while shift < _LANES:
                    ss_full = ss_full + pltpu.roll(ss_full, shift=shift, axis=1)
                    shift *= 2
                ix = 0.5 * (s_full * s_full - ss_full)
                o_ref[pl.ds(r0, rc), :] = ix[:, 0:D].astype(o_ref.dtype)
        else:
            # Fallback: stream fields with D-wide slices (used when the
            # lane-aligned grouping does not apply).
            x0 = x_ref[pl.ds(r0, rc), 0:D].astype(jnp.float32)
            s, ss = x0, x0 * x0
            for f in range(1, F):  # static, unrolled (F is small/known)
                xf = x_ref[pl.ds(r0, rc), f * D:(f + 1) * D].astype(jnp.float32)
                s = s + xf
                ss = ss + xf * xf
            ix = s * s - ss
            if reduce_sum:
                out = 0.5 * jnp.sum(ix, axis=1, keepdims=True)
                o_ref[pl.ds(r0, rc), :] = out.astype(o_ref.dtype)
            else:
                o_ref[pl.ds(r0, rc), :] = (0.5 * ix).astype(o_ref.dtype)
        return carry

    lax.fori_loop(0, n_chunks, chunk, 0)


def _target_block_bytes():
    """Per-generation input-block target; the op is HBM-BW bound so use big blocks."""
    try:
        kind = jax.devices()[0].device_kind.lower()
    except Exception:
        kind = ""
    if "v7" in kind:
        return 16 * 1024 * 1024  # ~3.2 TB/s HBM: amortize ~0.35 us/step overhead
    return 8 * 1024 * 1024       # v5e / v6e / unknown


def _choose_batch_tile(batch, row_vmem_bytes, target_bytes):
    row_vmem_bytes = max(row_vmem_bytes, 1)
    tb = max(8, target_bytes // row_vmem_bytes)
    # Double-buffered in+out blocks must fit the VMEM budget (v7x: 64 MiB physical).
    tb = min(tb, max(8, _VMEM_BLOCK_BUDGET // (2 * row_vmem_bytes)))
    # Never bigger than the (sublane-rounded) batch.
    tb = min(tb, _round_up(batch, 8))
    # Keep >= 2 grid steps when the batch allows it, so BlockSpec
    # double-buffering overlaps DMA with compute (and megacore shards on v7x).
    if batch >= 16:
        tb = min(tb, _round_up(-(-batch // 2), 8))
    return max(8, (tb // 8) * 8)


def factorization_machine(x, reduce_sum=True, *, batch_tile=None):
    """x: (B, F, D) array. Matches FactorizationMachine.forward semantics."""
    B, F, D = x.shape
    FD = F * D
    itemsize = jnp.dtype(x.dtype).itemsize
    out_cols = 1 if reduce_sum else D

    # Lane-dense (B, F*D) view: free for a contiguous array, removes lane
    # padding of the input block and keeps every input DMA fully contiguous.
    x2 = x.reshape(B, FD)

    # Lane-aligned group accumulation applies when each 128-lane column group
    # holds an integer number of fields.
    grouped = (D <= _LANES) and (_LANES % D == 0) and (FD % _LANES == 0)

    lanes_in = _round_up(FD, _LANES)
    lanes_out = _round_up(out_cols, _LANES)
    row_vmem_bytes = (lanes_in + lanes_out) * itemsize
    # TODO(synk): for extremely large F*D (a single 8-row block over the VMEM
    # budget) add a second "arbitrary" grid axis over column groups with a
    # VMEM scratch accumulator instead of one full-width block.

    if batch_tile is not None:
        tb = max(8, (batch_tile // 8) * 8)
    else:
        tb = _choose_batch_tile(B, row_vmem_bytes, _target_block_bytes())

    # Row sub-chunk small enough that the f32 accumulators stay in vregs.
    acc_lanes = _LANES if grouped else _round_up(D, _LANES)
    rc = max(8, min(64, ((12288 // acc_lanes) // 8) * 8))
    rc = min(rc, tb)
    tb = max(rc, (tb // rc) * rc)

    grid = (pl.cdiv(B, tb),)

    in_block_bytes = tb * lanes_in * itemsize
    out_block_bytes = tb * lanes_out * itemsize
    vmem_limit = 2 * (in_block_bytes + out_block_bytes) + (4 << 20)
    vmem_limit = int(min(max(vmem_limit, 32 << 20), 48 << 20))

    kernel = functools.partial(
        _fm_kernel, num_fields=F, embed_dim=D, row_chunk=rc,
        grouped=grouped, reduce_sum=reduce_sum)

    return pl.pallas_call(
        kernel,
        out_shape=jax.ShapeDtypeStruct((B, out_cols), x.dtype),
        grid_spec=pltpu.PrefetchScalarGridSpec(
            num_scalar_prefetch=0,
            grid=grid,
            in_specs=[pl.BlockSpec((tb, FD), lambda i: (i, 0))],
            out_specs=pl.BlockSpec((tb, out_cols), lambda i: (i, 0)),
        ),
        compiler_params=pltpu.CompilerParams(
            dimension_semantics=("parallel",),
            vmem_limit_bytes=vmem_limit),
        cost_estimate=pl.CostEstimate(
            flops=4 * B * FD,
            transcendentals=0,
            bytes_accessed=(B * FD + B * out_cols) * itemsize),
    )(x2)


def _reference(x, reduce_sum=True):
    square_of_sum = jnp.sum(x, axis=1) ** 2
    sum_of_square = jnp.sum(x ** 2, axis=1)
    ix = square_of_sum - sum_of_square
    if reduce_sum:
        ix = jnp.sum(ix, axis=1, keepdims=True)
    return 0.5 * ix


if __name__ == "__main__":
    key = jax.random.PRNGKey(0)
    B, F, D = 8, 4, 32  # batch, num_fields, embed_dim  (grouped / lane-aligned path)
    x = jax.random.normal(key, (B, F, D), dtype=jnp.float32)

    # reduce_sum=True
    out = jax.block_until_ready(factorization_machine(x, reduce_sum=True))
    ref = _reference(x, reduce_sum=True)
    assert out.shape == (B, 1)
    assert jnp.allclose(out, ref, atol=1e-4, rtol=1e-4)

    # reduce_sum=False
    out_nr = jax.block_until_ready(factorization_machine(x, reduce_sum=False))
    ref_nr = _reference(x, reduce_sum=False)
    assert out_nr.shape == (B, D)
    assert jnp.allclose(out_nr, ref_nr, atol=1e-4, rtol=1e-4)

    # Ragged batch: exercises the partial-final-block handling (no jnp.pad).
    B2 = 10
    x_rag = jax.random.normal(jax.random.PRNGKey(0), (B2, F, D), dtype=jnp.float32)
    out_rag = jax.block_until_ready(factorization_machine(x_rag, reduce_sum=True))
    assert out_rag.shape == (B2, 1)
    assert jnp.allclose(out_rag, _reference(x_rag, True), atol=1e-4, rtol=1e-4)

    # Fallback (non-grouped) path: F*D not a multiple of 128.
    B3, F3, D3 = 16, 5, 32
    x_fb = jax.random.normal(jax.random.PRNGKey(1), (B3, F3, D3), dtype=jnp.float32)
    out_fb = jax.block_until_ready(factorization_machine(x_fb, reduce_sum=False))
    assert out_fb.shape == (B3, D3)
    assert jnp.allclose(out_fb, _reference(x_fb, False), atol=1e-4, rtol=1e-4)

    print("KERNEL_OK")
</pallas_src>

<mosaic_0001>
module attributes {stable_mosaic.version = 11 : i64} {
  func.func @_fm_kernel(%arg0: i32, %arg1: memref<8x128xf32, #tpu.memory_space<vmem>>, %arg2: memref<8x1xf32, #tpu.memory_space<vmem>>) attributes {dimension_semantics = [#tpu.dimension_semantics<parallel>], iteration_bounds = array<i64: 1>, scalar_prefetch = 0 : i64, scratch_operands = 0 : i64, tpu.core_type = #tpu.core_type<tc>, window_params = [{transform_indices = @transform_0, window_bounds = array<i64: 8, 128>}, {transform_indices = @transform_1, window_bounds = array<i64: 8, 1>}]} {
    %c0_i32 = arith.constant 0 : i32
    %c8_i32 = arith.constant 8 : i32
    %0 = arith.muli %c0_i32, %c8_i32 : i32
    %1 = tpu.assume_multiple %0, 8 : i32
    %2 = arith.index_cast %1 : i32 to index
    %c0 = arith.constant 0 : index
    %3 = vector.load %arg1[%2, %c0] : memref<8x128xf32, #tpu.memory_space<vmem>>, vector<8x128xf32>
    %4 = arith.mulf %3, %3 : vector<8x128xf32>
    %c32_i32 = arith.constant 32 : i32
    %5 = tpu.dynamic_rotate %3 by %c32_i32 dim 1 : vector<8x128xf32>, i32 -> vector<8x128xf32>
    %6 = arith.addf %3, %5 : vector<8x128xf32>
    %c64_i32 = arith.constant 64 : i32
    %7 = tpu.dynamic_rotate %6 by %c64_i32 dim 1 : vector<8x128xf32>, i32 -> vector<8x128xf32>
    %8 = arith.addf %6, %7 : vector<8x128xf32>
    %9 = arith.mulf %8, %8 : vector<8x128xf32>
    %cst = arith.constant 2.500000e-01 : f32
    %10 = vector.broadcast %cst : f32 to vector<8x128xf32>
    %11 = arith.mulf %9, %10 : vector<8x128xf32>
    %12 = arith.subf %11, %4 : vector<8x128xf32>
    %cst_0 = arith.constant dense<0.000000e+00> : vector<8xf32>
    %13 = vector.multi_reduction <add>, %12, %cst_0 [1] : vector<8x128xf32> to vector<8xf32>
    %14 = vector.shape_cast %13 : vector<8xf32> to vector<8x1xf32>
    %cst_1 = arith.constant 5.000000e-01 : f32
    %15 = vector.broadcast %cst_1 : f32 to vector<8x1xf32>
    %16 = arith.mulf %15, %14 : vector<8x1xf32>
    %17 = arith.index_cast %1 : i32 to index
    %c0_2 = arith.constant 0 : index
    %18 = vector.load %arg2[%17, %c0_2] : memref<8x1xf32, #tpu.memory_space<vmem>>, vector<8x1xf32>
    tpu.vector_store %arg2[%17, %c0_2], %16 {strides = array<i32>} : memref<8x1xf32, #tpu.memory_space<vmem>>, vector<8x1xf32>,
    %c1_i32 = arith.constant 1 : i32
    return
  }
  func.func @transform_0(%arg0: i32) -> (i32, i32) {
    %c0_i32 = arith.constant 0 : i32
    %c0_i32_0 = arith.constant 0 : i32
    return %arg0, %c0_i32 : i32, i32
  }
  func.func @transform_1(%arg0: i32) -> (i32, i32) {
    %c0_i32 = arith.constant 0 : i32
    %c0_i32_0 = arith.constant 0 : i32
    return %arg0, %c0_i32 : i32, i32
  }
}

</mosaic_0001>

<bundles_post_ra>
// kernel: tpu_custom_call.1
= control target key start
LH: loop header
LB: loop body
LE: loop exit
PB: predicated region body
PF: predicated region fallthrough
CT: control target
= control target key end

     0   :  { %6 = vsyncpa [#allocation3], 0  ;;  %s68_s6 = smov [#allocation2]   ;;  %s96_s0 = inlined_call_operand.hbm [shape: f32[8,128], index: 0, kind: input, shape index: {}]   ;;  %s97_s1 = inlined_call_operand.vmem [shape: f32[8,1], index: 1, kind: output, shape index: {}]  }
   0x1   :  { %s13_s7 = sshll.u32 %s68_s6, 4  ;;  %s44_s10 = scalar_lea.hbm %s96_s0, 128  ;;  %s14_s7 = int_to_ptr.vmem [resolvable:$true] %s13_s7 }
   0x2   :  { %p45_p0 = scmp.ne.s32.totalorder %s96_s0, %s44_s10  ;;  %p48_p1 = scmp.lt.u32.totalorder %s44_s10, %s96_s0 }
   0x4   :  { %p50_p2 = pnand %p48_p1, %p45_p0 }
   0x6   :  { %53 = shalt.err (!%p50_p2)
}
   0x7   :  { %s54_s15 = scalar_lea.vmem %s14_s7, 128  ;;  %p59_p4 = scmp.lt.s32.totalorder %s14_s7, %s14_s7 }
   0x8   :  { %p55_p3 = scmp.ne.s32.totalorder %s14_s7, %s54_s15  ;;  %p60_p5 = scmp.lt.s32.totalorder %s54_s15, %s54_s15 }
   0xa   :  { %p61_p6 = por %p60_p5, %p59_p4 }
   0xc   :  { %p62_p7 = pnand %p61_p6, %p55_p3 }
   0xe   :  { %65 = shalt.err (!%p62_p7)
}
   0xf   :  { %16 = dma.hbm_to_vmem [thread:$0]  %s96_s0, 128, %s14_s7, [#allocation3]  }
  0x10   :  { %66 = dma.done.wait [#allocation3], 128  }
  0x11   :  { %67 = vsyncadd [#allocation3], 4294967168  ;;  %v20_v0 = vld [vmem:[#allocation2] sm:$0xff]  ;;  %s69_s18 = smov 32   ;;  %s70_s19 = smov 64   ;;  %vm34_vm0 = vcmask 7168  }
  0x12   :  { %22 = vrot.lane.b32.xlu0 %v20_v0, %s69_s18  ;;  %v21_v6 = vmul.f32 %v20_v0, %v20_v0 }
  0x84   :  { %v23_v1 = vpop.permute.xlu0 %22 }
  0x85   :  { %v24_v2 = vadd.f32 %v23_v1, %v20_v0 }
  0x87   :  { %25 = vrot.lane.b32.xlu0 %v24_v2, %s70_s19 }
  0xf9   :  { %v26_v3 = vpop.permute.xlu0 %25 }
  0xfa   :  { %v27_v4 = vadd.f32 %v26_v3, %v24_v2 }
  0xfc   :  { %v28_v5 = vmul.f32 %v27_v4, %v27_v4 }
  0xfe   :  { %v29_v7 = vmul.f32 0.25, %v28_v5 }
 0x100   :  { %v30_v8 = vsub.f32 %v29_v7, %v21_v6 }
 0x102   :  { %31 = vadd.xlane.f32.xlu1 %v30_v8 }
 0x18f   :  { %v32_v9 = vpop.xlane.xlu1 %31 }
 0x190   :  { %v33_v10 = vmul.f32 0.5, %v32_v9 }
 0x192   :  { %35 = vst.msk [vmem:[%s97_s1] sm:$0xff] %vm34_vm0, %v33_v10 }
 0x193   :  { %40 = vsyncpa [#allocation3], 1 }

</bundles_post_ra>
